<compile_context>
chip_gen: v7x
topology: tpu7x:2x2x1
jax: 0.10.0
libtpu: 0.0.40
codegen_flags: <defaults>
</compile_context>

<pallas_src>
import functools

import numpy as np

import jax
import jax.numpy as jnp
from jax.experimental import pallas as pl
from jax.experimental.pallas import tpu as pltpu


def _nearest_segments(T, Tp):
    """Static nearest-neighbor row indices, grouped into contiguous runs."""
    idx = np.minimum((np.arange(Tp) * T) // Tp, T - 1)
    segs = []
    start = 0
    for i in range(1, Tp + 1):
        if i == Tp or idx[i] != idx[i - 1] + 1:
            segs.append((int(idx[start]), int(i - start)))
            start = i
    return tuple(segs)


def _pick_block_b(B):
    """Batch elements per grid step: amortize per-step overhead but keep >=2
    grid steps (v7x has 2 TensorCores)."""
    if B <= 2:
        return 1
    best = 1
    for bb in range(1, min(8, B // 2) + 1):
        if B % bb == 0:
            best = bb
    return best


def tsblock_kernel(segs,
                   x_ref, convw_ref, convb_ref, gamma_ref, beta_ref,
                   wqkv_ref, bqkv_ref, wp_ref, bp_ref, mask_ref,
                   r_ref, h_ref):
    BB = x_ref.shape[0]
    K = convw_ref.shape[0]
    Tp = h_ref.shape[1]
    D = h_ref.shape[2]

    # ---- hoist parameter loads out of the per-batch loop ----
    convw = [convw_ref[j] for j in range(K)]          # K x (C, D) bf16
    convb = convb_ref[0][None, :]                     # (1, D)  f32
    gamma = gamma_ref[0][None, :]
    beta = beta_ref[0][None, :]
    wqkv = wqkv_ref[...]                              # (D, 3D) bf16
    bqkv = bqkv_ref[0][None, :]                       # (1, 3D) f32
    wp = wp_ref[...]                                  # (D, D)  bf16
    bp = bp_ref[0][None, :]
    mask = mask_ref[...]                              # (D, D)  f32, holds 1/Tp

    for bb in range(BB):                              # short static unrolled loop
        xt = x_ref[bb]                                # (T, C) bf16

        # ---- Conv1d(dim, dim, k) as K shifted (sublane-sliced) matmuls ----
        acc = jnp.dot(xt[0:Tp, :], convw[0], preferred_element_type=jnp.float32)
        for j in range(1, K):
            acc = acc + jnp.dot(xt[j:j + Tp, :], convw[j],
                                preferred_element_type=jnp.float32)
        y = acc + convb                               # (Tp, D) f32

        # ---- LayerNorm over channel dim (eps = 1e-6), f32 statistics ----
        mean = jnp.mean(y, axis=-1, keepdims=True)
        var = jnp.mean((y - mean) ** 2, axis=-1, keepdims=True)
        t = (y - mean) * jax.lax.rsqrt(var + 1e-6)
        t = t * gamma + beta                          # (Tp, D) f32

        # ---- fused QKV: single (Tp, D) @ (D, 3D) matmul ----
        qkv = jnp.dot(t.astype(jnp.bfloat16), wqkv,
                      preferred_element_type=jnp.float32) + bqkv
        q = qkv[:, :D]
        kk = qkv[:, D:2 * D]
        v = qkv[:, 2 * D:]

        # ---- no-softmax multi-head attention via linear identity:
        #      out_h = q_h @ (k_h^T @ v_h) / Tp
        #            = q @ ( block_diag_mask/Tp  ⊙  (k^T @ v) ) ----
        m = jax.lax.dot_general(kk.astype(jnp.bfloat16), v.astype(jnp.bfloat16),
                                (((0,), (0,)), ((), ())),
                                preferred_element_type=jnp.float32)
        m = m * mask                                  # block-diag + 1/Tp in one VPU mul
        a = jnp.dot(q.astype(jnp.bfloat16), m.astype(jnp.bfloat16),
                    preferred_element_type=jnp.float32)

        # ---- output projection + tanh (EUP) ----
        hfin = jnp.tanh(jnp.dot(a.astype(jnp.bfloat16), wp,
                                preferred_element_type=jnp.float32) + bp)
        h_ref[bb] = hfin                              # (Tp, D) f32

        # ---- F.interpolate(x, size=Tp, mode='nearest'): static contiguous
        #      sublane row slices of the resident x tile, then residual add ----
        parts = [xt[s:s + l, :] for (s, l) in segs]
        xdn = parts[0] if len(parts) == 1 else jnp.concatenate(parts, axis=0)
        r_ref[bb] = xdn.astype(jnp.float32) + hfin    # (Tp, C) — lane-dense store


def tsblock_forward(x, params, k, num_head, block_b=None):
    B, C, T = x.shape
    D = C
    Tp = T - k + 1
    H = num_head
    assert D % H == 0
    dh = D // H

    BB = block_b if block_b is not None else _pick_block_b(B)
    assert B % BB == 0

    # ---- layout / dtype plumbing (wrapper glue) ----
    x_t = jnp.transpose(x, (0, 2, 1)).astype(jnp.bfloat16)                    # (B, T, C)
    convw = jnp.transpose(params["conv_w"], (2, 1, 0)).astype(jnp.bfloat16)   # (k, C, D)
    convb = params["conv_b"].reshape(1, D).astype(jnp.float32)
    gamma = params["ln_g"].reshape(1, D).astype(jnp.float32)
    beta = params["ln_b"].reshape(1, D).astype(jnp.float32)
    wqkv = jnp.concatenate([params["wq"].T, params["wk"].T, params["wv"].T],
                           axis=1).astype(jnp.bfloat16)                       # (D, 3D)
    bqkv = jnp.concatenate([params["bq"], params["bk"], params["bv"]]
                           ).reshape(1, 3 * D).astype(jnp.float32)
    wp = params["wp"].T.astype(jnp.bfloat16)                                  # (D, D)
    bp = params["bp"].reshape(1, D).astype(jnp.float32)

    # block-diagonal head mask with the 1/Tp attention scale folded in
    head = np.arange(D) // dh
    mask = jnp.asarray((head[:, None] == head[None, :]).astype(np.float32) / Tp)

    segs = _nearest_segments(T, Tp)
    kernel = functools.partial(tsblock_kernel, segs)

    def fullspec(shape):
        nd = len(shape)
        return pl.BlockSpec(shape, lambda b, _nd=nd: (0,) * _nd)

    # TODO(synk): for very large D on v7x (64 MiB VMEM), set vmem_limit_bytes /
    # single-buffer the constant-index weight specs; unnecessary at these sizes.
    r_tc, h = pl.pallas_call(
        kernel,
        out_shape=(jax.ShapeDtypeStruct((B, Tp, C), jnp.float32),
                   jax.ShapeDtypeStruct((B, Tp, D), jnp.float32)),
        grid_spec=pltpu.PrefetchScalarGridSpec(
            num_scalar_prefetch=0,
            grid=(B // BB,),
            in_specs=[
                pl.BlockSpec((BB, T, C), lambda b: (b, 0, 0)),   # x (B, T, C) bf16
                fullspec((k, C, D)),                             # conv weight
                fullspec((1, D)),                                # conv bias
                fullspec((1, D)),                                # ln gamma
                fullspec((1, D)),                                # ln beta
                fullspec((D, 3 * D)),                            # fused qkv weight
                fullspec((1, 3 * D)),                            # fused qkv bias
                fullspec((D, D)),                                # proj weight
                fullspec((1, D)),                                # proj bias
                fullspec((D, D)),                                # head mask / Tp
            ],
            out_specs=[
                pl.BlockSpec((BB, Tp, C), lambda b: (b, 0, 0)),  # r (lane-dense)
                pl.BlockSpec((BB, Tp, D), lambda b: (b, 0, 0)),  # h
            ],
        ),
        compiler_params=pltpu.CompilerParams(
            dimension_semantics=("parallel",)),
    )(x_t, convw, convb, gamma, beta, wqkv, bqkv, wp, bp, mask)

    r = jnp.transpose(r_tc, (0, 2, 1))   # back to the module's (B, C, Tp) layout
    return r, h


def tsblock_reference(x, params, k, num_head):
    """Pure-JAX f32 reference mirroring the PyTorch module."""
    B, C, T = x.shape
    D = C
    Tp = T - k + 1
    H = num_head
    dh = D // H

    windows = jnp.stack([x[:, :, j:j + Tp] for j in range(k)], axis=-1)  # (B,C,Tp,k)
    y = jnp.einsum("bctj,ocj->bto", windows, params["conv_w"]) + params["conv_b"]

    mean = jnp.mean(y, -1, keepdims=True)
    var = jnp.mean((y - mean) ** 2, -1, keepdims=True)
    t = (y - mean) / jnp.sqrt(var + 1e-6) * params["ln_g"] + params["ln_b"]

    q = t @ params["wq"].T + params["bq"]
    kk = t @ params["wk"].T + params["bk"]
    v = t @ params["wv"].T + params["bv"]

    def heads(z):
        return z.reshape(B, Tp, H, dh).transpose(0, 2, 1, 3)   # (B,H,Tp,dh)

    qh, kh, vh = heads(q), heads(kk), heads(v)
    scores = jnp.einsum("bhqd,bhkd->bhqk", qh, kh) / Tp
    a = jnp.einsum("bhqk,bhkd->bhqd", scores, vh)
    a = a.transpose(0, 2, 1, 3).reshape(B, Tp, D)

    h = jnp.tanh(a @ params["wp"].T + params["bp"])

    idx = jnp.minimum((jnp.arange(Tp) * T) // Tp, T - 1)
    x_down = x[:, :, idx]
    r = x_down + jnp.transpose(h, (0, 2, 1))
    return r, h


def init_params(key, dim, k):
    ks = jax.random.split(key, 12)
    s_conv = 1.0 / jnp.sqrt(dim * k)
    s_lin = 1.0 / jnp.sqrt(dim)
    return {
        "conv_w": jax.random.normal(ks[0], (dim, dim, k), jnp.float32) * s_conv,
        "conv_b": jax.random.normal(ks[1], (dim,), jnp.float32) * s_conv,
        "ln_g": jnp.ones((dim,), jnp.float32),
        "ln_b": jnp.zeros((dim,), jnp.float32),
        "wq": jax.random.normal(ks[2], (dim, dim), jnp.float32) * s_lin,
        "bq": jax.random.normal(ks[3], (dim,), jnp.float32) * s_lin,
        "wk": jax.random.normal(ks[4], (dim, dim), jnp.float32) * s_lin,
        "bk": jax.random.normal(ks[5], (dim,), jnp.float32) * s_lin,
        "wv": jax.random.normal(ks[6], (dim, dim), jnp.float32) * s_lin,
        "bv": jax.random.normal(ks[7], (dim,), jnp.float32) * s_lin,
        "wp": jax.random.normal(ks[8], (dim, dim), jnp.float32) * s_lin,
        "bp": jax.random.normal(ks[9], (dim,), jnp.float32) * s_lin,
    }


if __name__ == "__main__":
    B, DIM, T = 2, 32, 16
    K, NHEAD = 3, 4

    root = jax.random.PRNGKey(0)
    kx, kp = jax.random.split(root)
    x = jax.random.normal(kx, (B, DIM, T), jnp.float32)
    params = init_params(kp, DIM, K)

    r, h = jax.block_until_ready(tsblock_forward(x, params, K, NHEAD))
    r_ref, h_ref = tsblock_reference(x, params, K, NHEAD)

    assert r.shape == (B, DIM, T - K + 1) and h.shape == (B, T - K + 1, DIM)
    # bf16 MXU operands (f32 accumulation) introduce ~1e-2-level rounding.
    assert jnp.allclose(r, r_ref, atol=5e-2, rtol=5e-2)
    assert jnp.allclose(h, h_ref, atol=5e-2, rtol=5e-2)
    print("KERNEL_OK")
</pallas_src>

<mosaic_0001>
module attributes {stable_mosaic.version = 11 : i64} {
  func.func @tsblock_kernel(%arg0: i32, %arg1: memref<1x16x32xbf16, #tpu.memory_space<vmem>>, %arg2: memref<3x32x32xbf16, #tpu.memory_space<vmem>>, %arg3: memref<1x32xf32, #tpu.memory_space<vmem>>, %arg4: memref<1x32xf32, #tpu.memory_space<vmem>>, %arg5: memref<1x32xf32, #tpu.memory_space<vmem>>, %arg6: memref<32x96xbf16, #tpu.memory_space<vmem>>, %arg7: memref<1x96xf32, #tpu.memory_space<vmem>>, %arg8: memref<32x32xbf16, #tpu.memory_space<vmem>>, %arg9: memref<1x32xf32, #tpu.memory_space<vmem>>, %arg10: memref<32x32xf32, #tpu.memory_space<vmem>>, %arg11: memref<1x14x32xf32, #tpu.memory_space<vmem>>, %arg12: memref<1x14x32xf32, #tpu.memory_space<vmem>>) attributes {dimension_semantics = [#tpu.dimension_semantics<parallel>], iteration_bounds = array<i64: 2>, scalar_prefetch = 0 : i64, scratch_operands = 0 : i64, tpu.core_type = #tpu.core_type<tc>, window_params = [{transform_indices = @transform_0, window_bounds = array<i64: 1, 16, 32>}, {pipeline_mode = #tpu.pipeline_mode<synchronous>, transform_indices = @transform_1, window_bounds = array<i64: 3, 32, 32>}, {pipeline_mode = #tpu.pipeline_mode<synchronous>, transform_indices = @transform_2, window_bounds = array<i64: 1, 32>}, {pipeline_mode = #tpu.pipeline_mode<synchronous>, transform_indices = @transform_3, window_bounds = array<i64: 1, 32>}, {pipeline_mode = #tpu.pipeline_mode<synchronous>, transform_indices = @transform_4, window_bounds = array<i64: 1, 32>}, {pipeline_mode = #tpu.pipeline_mode<synchronous>, transform_indices = @transform_5, window_bounds = array<i64: 32, 96>}, {pipeline_mode = #tpu.pipeline_mode<synchronous>, transform_indices = @transform_6, window_bounds = array<i64: 1, 96>}, {pipeline_mode = #tpu.pipeline_mode<synchronous>, transform_indices = @transform_7, window_bounds = array<i64: 32, 32>}, {pipeline_mode = #tpu.pipeline_mode<synchronous>, transform_indices = @transform_8, window_bounds = array<i64: 1, 32>}, {pipeline_mode = #tpu.pipeline_mode<synchronous>, transform_indices = @transform_9, window_bounds = array<i64: 32, 32>}, {transform_indices = @transform_10, window_bounds = array<i64: 1, 14, 32>}, {transform_indices = @transform_11, window_bounds = array<i64: 1, 14, 32>}]} {
    %c0 = arith.constant 0 : index
    %c0_0 = arith.constant 0 : index
    %c0_1 = arith.constant 0 : index
    %0 = vector.load %arg2[%c0, %c0_0, %c0_1] : memref<3x32x32xbf16, #tpu.memory_space<vmem>>, vector<1x32x32xbf16>
    %1 = vector.shape_cast %0 : vector<1x32x32xbf16> to vector<32x32xbf16>
    %c1 = arith.constant 1 : index
    %c0_2 = arith.constant 0 : index
    %c0_3 = arith.constant 0 : index
    %2 = vector.load %arg2[%c1, %c0_2, %c0_3] : memref<3x32x32xbf16, #tpu.memory_space<vmem>>, vector<1x32x32xbf16>
    %3 = vector.shape_cast %2 : vector<1x32x32xbf16> to vector<32x32xbf16>
    %c2 = arith.constant 2 : index
    %c0_4 = arith.constant 0 : index
    %c0_5 = arith.constant 0 : index
    %4 = vector.load %arg2[%c2, %c0_4, %c0_5] : memref<3x32x32xbf16, #tpu.memory_space<vmem>>, vector<1x32x32xbf16>
    %5 = vector.shape_cast %4 : vector<1x32x32xbf16> to vector<32x32xbf16>
    %c0_6 = arith.constant 0 : index
    %c0_7 = arith.constant 0 : index
    %6 = vector.load %arg3[%c0_6, %c0_7] : memref<1x32xf32, #tpu.memory_space<vmem>>, vector<1x32xf32>
    %7 = vector.shape_cast %6 : vector<1x32xf32> to vector<32xf32>
    %8 = vector.shape_cast %7 : vector<32xf32> to vector<1x32xf32>
    %c0_8 = arith.constant 0 : index
    %c0_9 = arith.constant 0 : index
    %9 = vector.load %arg4[%c0_8, %c0_9] : memref<1x32xf32, #tpu.memory_space<vmem>>, vector<1x32xf32>
    %10 = vector.shape_cast %9 : vector<1x32xf32> to vector<32xf32>
    %11 = vector.shape_cast %10 : vector<32xf32> to vector<1x32xf32>
    %c0_10 = arith.constant 0 : index
    %c0_11 = arith.constant 0 : index
    %12 = vector.load %arg5[%c0_10, %c0_11] : memref<1x32xf32, #tpu.memory_space<vmem>>, vector<1x32xf32>
    %13 = vector.shape_cast %12 : vector<1x32xf32> to vector<32xf32>
    %14 = vector.shape_cast %13 : vector<32xf32> to vector<1x32xf32>
    %c0_12 = arith.constant 0 : index
    %c0_13 = arith.constant 0 : index
    %15 = vector.load %arg6[%c0_12, %c0_13] : memref<32x96xbf16, #tpu.memory_space<vmem>>, vector<32x96xbf16>
    %c0_14 = arith.constant 0 : index
    %c0_15 = arith.constant 0 : index
    %16 = vector.load %arg7[%c0_14, %c0_15] : memref<1x96xf32, #tpu.memory_space<vmem>>, vector<1x96xf32>
    %17 = vector.shape_cast %16 : vector<1x96xf32> to vector<96xf32>
    %18 = vector.shape_cast %17 : vector<96xf32> to vector<1x96xf32>
    %c0_16 = arith.constant 0 : index
    %c0_17 = arith.constant 0 : index
    %19 = vector.load %arg8[%c0_16, %c0_17] : memref<32x32xbf16, #tpu.memory_space<vmem>>, vector<32x32xbf16>
    %c0_18 = arith.constant 0 : index
    %c0_19 = arith.constant 0 : index
    %20 = vector.load %arg9[%c0_18, %c0_19] : memref<1x32xf32, #tpu.memory_space<vmem>>, vector<1x32xf32>
    %21 = vector.shape_cast %20 : vector<1x32xf32> to vector<32xf32>
    %22 = vector.shape_cast %21 : vector<32xf32> to vector<1x32xf32>
    %c0_20 = arith.constant 0 : index
    %c0_21 = arith.constant 0 : index
    %23 = vector.load %arg10[%c0_20, %c0_21] : memref<32x32xf32, #tpu.memory_space<vmem>>, vector<32x32xf32>
    %c0_22 = arith.constant 0 : index
    %c0_23 = arith.constant 0 : index
    %c0_24 = arith.constant 0 : index
    %24 = vector.load %arg1[%c0_22, %c0_23, %c0_24] : memref<1x16x32xbf16, #tpu.memory_space<vmem>>, vector<1x16x32xbf16>
    %25 = vector.shape_cast %24 : vector<1x16x32xbf16> to vector<16x32xbf16>
    %26 = vector.extract_strided_slice %25 {offsets = [0, 0], sizes = [14, 32], strides = [1, 1]} : vector<16x32xbf16> to vector<14x32xbf16>
    %cst = arith.constant dense<0.000000e+00> : vector<14x32xf32>
    %27 = tpu.matmul %26, %1, %cst {dimension_numbers = #tpu.dot_dimension_numbers<[1], [0], [0], [1], [0, 0, 1, 1], [], []>} : vector<14x32xbf16>, vector<32x32xbf16>, vector<14x32xf32> -> vector<14x32xf32>
    %28 = vector.extract_strided_slice %25 {offsets = [1, 0], sizes = [14, 32], strides = [1, 1]} : vector<16x32xbf16> to vector<14x32xbf16>
    %cst_25 = arith.constant dense<0.000000e+00> : vector<14x32xf32>
    %29 = tpu.matmul %28, %3, %cst_25 {dimension_numbers = #tpu.dot_dimension_numbers<[1], [0], [0], [1], [0, 0, 1, 1], [], []>} : vector<14x32xbf16>, vector<32x32xbf16>, vector<14x32xf32> -> vector<14x32xf32>
    %30 = arith.addf %27, %29 : vector<14x32xf32>
    %31 = vector.extract_strided_slice %25 {offsets = [2, 0], sizes = [14, 32], strides = [1, 1]} : vector<16x32xbf16> to vector<14x32xbf16>
    %cst_26 = arith.constant dense<0.000000e+00> : vector<14x32xf32>
    %32 = tpu.matmul %31, %5, %cst_26 {dimension_numbers = #tpu.dot_dimension_numbers<[1], [0], [0], [1], [0, 0, 1, 1], [], []>} : vector<14x32xbf16>, vector<32x32xbf16>, vector<14x32xf32> -> vector<14x32xf32>
    %33 = arith.addf %30, %32 : vector<14x32xf32>
    %34 = vector.broadcast %8 : vector<1x32xf32> to vector<14x32xf32>
    %35 = arith.addf %33, %34 : vector<14x32xf32>
    %cst_27 = arith.constant dense<0.000000e+00> : vector<14xf32>
    %36 = vector.multi_reduction <add>, %35, %cst_27 [1] : vector<14x32xf32> to vector<14xf32>
    %37 = vector.shape_cast %36 : vector<14xf32> to vector<14x1xf32>
    %cst_28 = arith.constant 3.200000e+01 : f32
    %38 = vector.broadcast %cst_28 : f32 to vector<14x1xf32>
    %39 = arith.divf %37, %38 : vector<14x1xf32>
    %40 = vector.broadcast %39 : vector<14x1xf32> to vector<14x32xf32>
    %41 = arith.subf %35, %40 : vector<14x32xf32>
    %42 = arith.mulf %41, %41 : vector<14x32xf32>
    %cst_29 = arith.constant dense<0.000000e+00> : vector<14xf32>
    %43 = vector.multi_reduction <add>, %42, %cst_29 [1] : vector<14x32xf32> to vector<14xf32>
    %44 = vector.shape_cast %43 : vector<14xf32> to vector<14x1xf32>
    %cst_30 = arith.constant 3.200000e+01 : f32
    %45 = vector.broadcast %cst_30 : f32 to vector<14x1xf32>
    %46 = arith.divf %44, %45 : vector<14x1xf32>
    %47 = vector.broadcast %39 : vector<14x1xf32> to vector<14x32xf32>
    %48 = arith.subf %35, %47 : vector<14x32xf32>
    %cst_31 = arith.constant 9.99999997E-7 : f32
    %49 = vector.broadcast %cst_31 : f32 to vector<14x1xf32>
    %50 = arith.addf %46, %49 : vector<14x1xf32>
    %51 = math.rsqrt %50 : vector<14x1xf32>
    %52 = vector.broadcast %51 : vector<14x1xf32> to vector<14x32xf32>
    %53 = arith.mulf %48, %52 : vector<14x32xf32>
    %54 = vector.broadcast %11 : vector<1x32xf32> to vector<14x32xf32>
    %55 = arith.mulf %53, %54 : vector<14x32xf32>
    %56 = vector.broadcast %14 : vector<1x32xf32> to vector<14x32xf32>
    %57 = arith.addf %55, %56 : vector<14x32xf32>
    %58 = arith.truncf %57 : vector<14x32xf32> to vector<14x32xbf16>
    %cst_32 = arith.constant dense<0.000000e+00> : vector<14x96xf32>
    %59 = tpu.matmul %58, %15, %cst_32 {dimension_numbers = #tpu.dot_dimension_numbers<[1], [0], [0], [1], [0, 0, 1, 1], [], []>} : vector<14x32xbf16>, vector<32x96xbf16>, vector<14x96xf32> -> vector<14x96xf32>
    %60 = vector.broadcast %18 : vector<1x96xf32> to vector<14x96xf32>
    %61 = arith.addf %59, %60 : vector<14x96xf32>
    %62 = vector.extract_strided_slice %61 {offsets = [0, 0], sizes = [14, 32], strides = [1, 1]} : vector<14x96xf32> to vector<14x32xf32>
    %63 = vector.extract_strided_slice %61 {offsets = [0, 32], sizes = [14, 32], strides = [1, 1]} : vector<14x96xf32> to vector<14x32xf32>
    %64 = vector.extract_strided_slice %61 {offsets = [0, 64], sizes = [14, 32], strides = [1, 1]} : vector<14x96xf32> to vector<14x32xf32>
    %65 = arith.truncf %63 : vector<14x32xf32> to vector<14x32xbf16>
    %66 = arith.truncf %64 : vector<14x32xf32> to vector<14x32xbf16>
    %cst_33 = arith.constant dense<0.000000e+00> : vector<32x32xf32>
    %67 = tpu.matmul %65, %66, %cst_33 {dimension_numbers = #tpu.dot_dimension_numbers<[0], [0], [1], [1], [0, 1, 1, 1], [], []>} : vector<14x32xbf16>, vector<14x32xbf16>, vector<32x32xf32> -> vector<32x32xf32>
    %68 = arith.mulf %67, %23 : vector<32x32xf32>
    %69 = arith.truncf %62 : vector<14x32xf32> to vector<14x32xbf16>
    %70 = arith.truncf %68 : vector<32x32xf32> to vector<32x32xbf16>
    %cst_34 = arith.constant dense<0.000000e+00> : vector<14x32xf32>
    %71 = tpu.matmul %69, %70, %cst_34 {dimension_numbers = #tpu.dot_dimension_numbers<[1], [0], [0], [1], [0, 0, 1, 1], [], []>} : vector<14x32xbf16>, vector<32x32xbf16>, vector<14x32xf32> -> vector<14x32xf32>
    %72 = arith.truncf %71 : vector<14x32xf32> to vector<14x32xbf16>
    %cst_35 = arith.constant dense<0.000000e+00> : vector<14x32xf32>
    %73 = tpu.matmul %72, %19, %cst_35 {dimension_numbers = #tpu.dot_dimension_numbers<[1], [0], [0], [1], [0, 0, 1, 1], [], []>} : vector<14x32xbf16>, vector<32x32xbf16>, vector<14x32xf32> -> vector<14x32xf32>
    %74 = vector.broadcast %22 : vector<1x32xf32> to vector<14x32xf32>
    %75 = arith.addf %73, %74 : vector<14x32xf32>
    %76 = math.tanh %75 : vector<14x32xf32>
    %c0_36 = arith.constant 0 : index
    %c0_37 = arith.constant 0 : index
    %c0_38 = arith.constant 0 : index
    %77 = vector.load %arg12[%c0_36, %c0_37, %c0_38] : memref<1x14x32xf32, #tpu.memory_space<vmem>>, vector<1x14x32xf32>
    %78 = vector.shape_cast %77 : vector<1x14x32xf32> to vector<14x32xf32>
    %79 = vector.shape_cast %76 : vector<14x32xf32> to vector<1x14x32xf32>
    tpu.vector_store %arg12[%c0_36, %c0_37, %c0_38], %79 {strides = array<i32>} : memref<1x14x32xf32, #tpu.memory_space<vmem>>, vector<1x14x32xf32>,
    %80 = vector.extract_strided_slice %25 {offsets = [0, 0], sizes = [7, 32], strides = [1, 1]} : vector<16x32xbf16> to vector<7x32xbf16>
    %81 = vector.extract_strided_slice %25 {offsets = [8, 0], sizes = [7, 32], strides = [1, 1]} : vector<16x32xbf16> to vector<7x32xbf16>
    %82 = tpu.concatenate %80, %81 in 0 : vector<7x32xbf16>, vector<7x32xbf16> -> vector<14x32xbf16>
    %83 = arith.extf %82 : vector<14x32xbf16> to vector<14x32xf32>
    %84 = arith.addf %83, %76 : vector<14x32xf32>
    %c0_39 = arith.constant 0 : index
    %c0_40 = arith.constant 0 : index
    %c0_41 = arith.constant 0 : index
    %85 = vector.load %arg11[%c0_39, %c0_40, %c0_41] : memref<1x14x32xf32, #tpu.memory_space<vmem>>, vector<1x14x32xf32>
    %86 = vector.shape_cast %85 : vector<1x14x32xf32> to vector<14x32xf32>
    %87 = vector.shape_cast %84 : vector<14x32xf32> to vector<1x14x32xf32>
    tpu.vector_store %arg11[%c0_39, %c0_40, %c0_41], %87 {strides = array<i32>} : memref<1x14x32xf32, #tpu.memory_space<vmem>>, vector<1x14x32xf32>,
    return
  }
  func.func @transform_0(%arg0: i32) -> (i32, i32, i32) {
    %c0_i32 = arith.constant 0 : i32
    %c0_i32_0 = arith.constant 0 : i32
    %c0_i32_1 = arith.constant 0 : i32
    return %arg0, %c0_i32, %c0_i32_0 : i32, i32, i32
  }
  func.func @transform_1(%arg0: i32) -> (i32, i32, i32) {
    %c0_i32 = arith.constant 0 : i32
    %c0_i32_0 = arith.constant 0 : i32
    %c0_i32_1 = arith.constant 0 : i32
    %c0_i32_2 = arith.constant 0 : i32
    return %c0_i32, %c0_i32_0, %c0_i32_1 : i32, i32, i32
  }
  func.func @transform_2(%arg0: i32) -> (i32, i32) {
    %c0_i32 = arith.constant 0 : i32
    %c0_i32_0 = arith.constant 0 : i32
    %c0_i32_1 = arith.constant 0 : i32
    return %c0_i32, %c0_i32_0 : i32, i32
  }
  func.func @transform_3(%arg0: i32) -> (i32, i32) {
    %c0_i32 = arith.constant 0 : i32
    %c0_i32_0 = arith.constant 0 : i32
    %c0_i32_1 = arith.constant 0 : i32
    return %c0_i32, %c0_i32_0 : i32, i32
  }
  func.func @transform_4(%arg0: i32) -> (i32, i32) {
    %c0_i32 = arith.constant 0 : i32
    %c0_i32_0 = arith.constant 0 : i32
    %c0_i32_1 = arith.constant 0 : i32
    return %c0_i32, %c0_i32_0 : i32, i32
  }
  func.func @transform_5(%arg0: i32) -> (i32, i32) {
    %c0_i32 = arith.constant 0 : i32
    %c0_i32_0 = arith.constant 0 : i32
    %c0_i32_1 = arith.constant 0 : i32
    return %c0_i32, %c0_i32_0 : i32, i32
  }
  func.func @transform_6(%arg0: i32) -> (i32, i32) {
    %c0_i32 = arith.constant 0 : i32
    %c0_i32_0 = arith.constant 0 : i32
    %c0_i32_1 = arith.constant 0 : i32
    return %c0_i32, %c0_i32_0 : i32, i32
  }
  func.func @transform_7(%arg0: i32) -> (i32, i32) {
    %c0_i32 = arith.constant 0 : i32
    %c0_i32_0 = arith.constant 0 : i32
    %c0_i32_1 = arith.constant 0 : i32
    return %c0_i32, %c0_i32_0 : i32, i32
  }
  func.func @transform_8(%arg0: i32) -> (i32, i32) {
    %c0_i32 = arith.constant 0 : i32
    %c0_i32_0 = arith.constant 0 : i32
    %c0_i32_1 = arith.constant 0 : i32
    return %c0_i32, %c0_i32_0 : i32, i32
  }
  func.func @transform_9(%arg0: i32) -> (i32, i32) {
    %c0_i32 = arith.constant 0 : i32
    %c0_i32_0 = arith.constant 0 : i32
    %c0_i32_1 = arith.constant 0 : i32
    return %c0_i32, %c0_i32_0 : i32, i32
  }
  func.func @transform_10(%arg0: i32) -> (i32, i32, i32) {
    %c0_i32 = arith.constant 0 : i32
    %c0_i32_0 = arith.constant 0 : i32
    %c0_i32_1 = arith.constant 0 : i32
    return %arg0, %c0_i32, %c0_i32_0 : i32, i32, i32
  }
  func.func @transform_11(%arg0: i32) -> (i32, i32, i32) {
    %c0_i32 = arith.constant 0 : i32
    %c0_i32_0 = arith.constant 0 : i32
    %c0_i32_1 = arith.constant 0 : i32
    return %arg0, %c0_i32, %c0_i32_0 : i32, i32, i32
  }
}

</mosaic_0001>

<bundles_post_ra>
// kernel: tpu_custom_call.1
= control target key start
LH: loop header
LB: loop body
LE: loop exit
PB: predicated region body
PF: predicated region fallthrough
CT: control target
= control target key end

     0   :  { %s2138_s0 = inlined_call_operand.hbm [shape: bf16[2,16,32], index: 0, kind: input, shape index: {}]   ;;  %s2139_s1 = inlined_call_operand.hbm [shape: bf16[3,32,32], index: 1, kind: input, shape index: {}]   ;;  %s2140_s2 = inlined_call_operand.vmem [shape: f32[1,32], index: 2, kind: input, shape index: {}]   ;;  %s2141_s3 = inlined_call_operand.vmem [shape: f32[1,32], index: 3, kind: input, shape index: {}]   ;;  %s2142_s4 = inlined_call_operand.hbm [shape: f32[1,32], index: 4, kind: input, shape index: {}]   ;;  %s2143_s5 = inlined_call_operand.hbm [shape: bf16[32,96], index: 5, kind: input, shape index: {}]   ;;  %s2144_s6 = inlined_call_operand.hbm [shape: f32[1,96], index: 6, kind: input, shape index: {}]   ;;  %s2145_s7 = inlined_call_operand.hbm [shape: bf16[32,32], index: 7, kind: input, shape index: {}]   ;;  %s2146_s8 = inlined_call_operand.hbm [shape: f32[1,32], index: 8, kind: input, shape index: {}]   ;;  %s2147_s9 = inlined_call_operand.vmem [shape: f32[32,32], index: 9, kind: input, shape index: {}]   ;;  %s2148_s10 = inlined_call_operand.vmem [shape: f32[2,14,32], index: 10, kind: output, shape index: {0}]   ;;  %s2149_s11 = inlined_call_operand.vmem [shape: f32[2,14,32], index: 11, kind: output, shape index: {1}]  }
   0x1   :  { %2153 = sst [smem:[#allocation17_spill]] %s2139_s1 }
   0x2   :  { %2154 = sst [smem:[#allocation18_spill]] %s2147_s9 }
   0x3   :  { %2155 = sst [smem:[#allocation19_spill]] %s2148_s10 }
   0x4   :  { %2156 = sst [smem:[#allocation20_spill]] %s2149_s11 }
   0x5   :  { %17 = vsyncpa [#allocation3], 0 }
   0x6   :  { %19 = vsyncpa [#allocation3 + $0x1], 0 }
   0x7   :  { %20 = vsyncpa [#allocation5], 0 }
   0x8   :  { %21 = vsyncpa [#allocation8], 0 }
   0x9   :  { %22 = vsyncpa [#allocation11], 0  ;;  %s1786_s17 = smov 0   ;;  %s1788_s18 = smov 0  }
   0xa   :  { %s1790_s19 = smov 0   ;;  %s1792_s20 = smov 0  }
   0xb LB: > { %s1713_s21 = smov [#allocation4]   ;;  %s1807_s23 = sadd.s32 4294967295, %s1711_s20   ;;  %s1711_s20 = sphi %s1792_s20, %s2177_s20   ;;  %s1707_s19 = sphi %s1790_s19, %s2176_s19   ;;  %s1703_s18 = sphi %s1788_s18, %s2175_s18   ;;  %s1699_s17 = sphi %s1786_s17, %s2174_s17  }
   0xc   : > { %s312_s22 = sshll.u32 %s1713_s21, 4  ;;  %p1211_p0 = scmp.ge.s32.totalorder %s1711_s20, 1  ;;  %s1812_s22 = int_to_ptr.vmem [resolvable:$true] %s312_s22 }
   0xd   : > { %p2151_p1 = scmp.eq.s32.totalorder %s1807_s23, 0  ;;  %p300_p2 = scmp.lt.s32.totalorder %s1711_s20, 3 }
   0xe   : > { %s1714_s25 = smov [#allocation7]   ;;  %s1715_s28 = smov [#allocation10]  }
   0xf   : > { %p1814_p3 = pnand %p1211_p0, %p300_p2  ;;  %s342_s26 = sshll.u32 %s1714_s25, 4  ;;  %s1826_s26 = int_to_ptr.vmem [resolvable:$true] %s342_s26 }
  0x10   : > { %s366_s29 = sshll.u32 %s1715_s28, 4  ;;  %s2159_s1 = sld [smem:[#allocation17_spill]]  ;;  %s1828_s29 = int_to_ptr.vmem [resolvable:$true] %s366_s29 }
  0x11   : > { %s2157_s24 = scalar_select %p1814_p3, 1, 0 }
  0x12   : > { %p1366_p4 = pneg %p1814_p3 }
  0x14   : > { %p1822_p5 = pnand %p1366_p4, %p2151_p1 }
  0x16   : > { %s1467_s13 = scalar_lea.hbm %s2159_s1, 768  ;;  %p1838_p7 = pneg %p1822_p5 }
  0x17   : > { %p1468_p6 = scmp.ne.s32.totalorder %s2159_s1, %s1467_s13  ;;  %p1474_p10 = scmp.lt.u32.totalorder %s1467_s13, %s2159_s1 }
  0x19   : > { %p1470_p8 = pnand %p1838_p7, %p1468_p6 }
  0x1b   : > { %p1471_p9 = pneg %p1470_p8 }
  0x1d   : > { %p1476_p11 = pnand %p1474_p10, %p1471_p9 }
  0x1f   : > { %1479 = shalt.err (!%p1476_p11)
}
  0x20   : > { %s1480_s28 = scalar_lea.vmem %s1812_s22, 768  ;;  %p1488_p2 = scmp.lt.s32.totalorder %s1812_s22, %s1812_s22 }
  0x21   : > { %p1481_p12 = scmp.ne.s32.totalorder %s1812_s22, %s1480_s28  ;;  %p1489_p4 = scmp.lt.s32.totalorder %s1480_s28, %s1480_s28 }
  0x23   : > { %p1483_p13 = pnand %p1481_p12, %p1838_p7  ;;  %p1490_p6 = por %p1489_p4, %p1488_p2 }
  0x25   : > { %p1484_p0 = pneg %p1483_p13 }
  0x27   : > { %p1491_p8 = pnand %p1490_p6, %p1484_p0 }
  0x29   : > { %1494 = shalt.err (!%p1491_p8)
}
  0x2a   : > { %s1716_s30 = smov 64   ;;  %s1717_s12 = smov 4  }
  0x2b   : > { %1369 = dma.hbm_to_vmem [thread:$0]  (!%p1822_p5), %s2159_s1, 768, %s1812_s22, [#allocation5], %s1716_s30, %s1716_s30, %s1717_s12  }
  0x2c   : > { %s1495_s25 = scalar_lea.hbm %s2143_s5, 256 }
  0x2d   : > { %p1496_p9 = scmp.ne.s32.totalorder %s2143_s5, %s1495_s25  ;;  %p1502_p12 = scmp.lt.u32.totalorder %s1495_s25, %s2143_s5 }
  0x2f   : > { %p1498_p10 = pnand %p1496_p9, %p1838_p7 }
  0x31   : > { %p1499_p11 = pneg %p1498_p10 }
  0x33   : > { %p1504_p13 = pnand %p1502_p12, %p1499_p11 }
  0x35   : > { %1507 = shalt.err (!%p1504_p13)
}
  0x36   : > { %s1508_s22 = scalar_lea.vmem %s1826_s26, 256  ;;  %p1516_p6 = scmp.lt.s32.totalorder %s1826_s26, %s1826_s26 }
  0x37   : > { %p1509_p0 = scmp.ne.s32.totalorder %s1826_s26, %s1508_s22  ;;  %p1517_p8 = scmp.lt.s32.totalorder %s1508_s22, %s1508_s22 }
  0x39   : > { %p1511_p2 = pnand %p1509_p0, %p1838_p7  ;;  %p1518_p9 = por %p1517_p8, %p1516_p6 }
  0x3b   : > { %p1512_p4 = pneg %p1511_p2 }
  0x3d   : > { %p1519_p10 = pnand %p1518_p9, %p1512_p4 }
  0x3f   : > { %1522 = shalt.err (!%p1519_p10)
}
  0x40   : > { %1375 = dma.hbm_to_vmem [thread:$0]  (!%p1822_p5), %s2143_s5, 256, %s1826_s26, [#allocation8], %s1716_s30, %s1716_s30, %s1717_s12  }
  0x41   : > { %s1523_s14 = scalar_lea.hbm %s2145_s7, 256 }
  0x42   : > { %p1524_p11 = scmp.ne.s32.totalorder %s2145_s7, %s1523_s14  ;;  %p1530_p0 = scmp.lt.u32.totalorder %s1523_s14, %s2145_s7 }
  0x44   : > { %p1526_p12 = pnand %p1524_p11, %p1838_p7 }
  0x46   : > { %p1527_p13 = pneg %p1526_p12 }
  0x48   : > { %p1532_p2 = pnand %p1530_p0, %p1527_p13 }
  0x4a   : > { %1535 = shalt.err (!%p1532_p2)
}
  0x4b   : > { %s1536_s26 = scalar_lea.vmem %s1828_s29, 256  ;;  %p1544_p9 = scmp.lt.s32.totalorder %s1828_s29, %s1828_s29 }
  0x4c   : > { %p1537_p4 = scmp.ne.s32.totalorder %s1828_s29, %s1536_s26  ;;  %p1545_p10 = scmp.lt.s32.totalorder %s1536_s26, %s1536_s26 }
  0x4e   : > { %p1539_p6 = pnand %p1537_p4, %p1838_p7  ;;  %p1546_p11 = por %p1545_p10, %p1544_p9 }
  0x50   : > { %p1540_p8 = pneg %p1539_p6 }
  0x52   : > { %p1547_p12 = pnand %p1546_p11, %p1540_p8 }
  0x54   : > { %1550 = shalt.err (!%p1547_p12)
}
  0x55   : > { %1381 = dma.hbm_to_vmem [thread:$0]  (!%p1822_p5), %s2145_s7, 256, %s1828_s29, [#allocation11], %s1716_s30, %s1716_s30, %s1717_s12  }
  0x56   : > { %s1718_s10 = smov [#allocation6]   ;;  %s1719_s13 = smov [#allocation9]  }
  0x57   : > { %s332_s11 = sshll.u32 %s1718_s10, 4  ;;  %s356_s14 = sshll.u32 %s1719_s13, 4  ;;  %s333_s11 = int_to_ptr.vmem [resolvable:$true] %s332_s11  ;;  %s357_s14 = int_to_ptr.vmem [resolvable:$true] %s356_s14 }
  0x58   : > { %s1551_s25 = scalar_lea.hbm %s2142_s4, 16 }
  0x59   : > { %p1552_p13 = scmp.ne.s32.totalorder %s2142_s4, %s1551_s25  ;;  %p1558_p4 = scmp.lt.u32.totalorder %s1551_s25, %s2142_s4 }
  0x5b   : > { %p1554_p0 = pnand %p1552_p13, %p1838_p7 }
  0x5d   : > { %p1555_p2 = pneg %p1554_p0 }
  0x5f   : > { %p1560_p6 = pnand %p1558_p4, %p1555_p2 }
  0x61   : > { %1563 = shalt.err (!%p1560_p6)
}
  0x62   : > { %s1564_s29 = scalar_lea.vmem %s333_s11, 16  ;;  %s1571_s9 = scalar_lea.vmem %s333_s11, 32 }
  0x63   : > { %p1565_p8 = scmp.ne.s32.totalorder %s333_s11, %s1564_s29  ;;  %p1572_p11 = scmp.lt.s32.totalorder %s333_s11, %s333_s11 }
  0x64   : > { %p1573_p12 = scmp.lt.s32.totalorder %s1571_s9, %s1564_s29 }
  0x65   : > { %p1567_p9 = pnand %p1565_p8, %p1838_p7 }
  0x66   : > { %p1574_p1 = por %p1573_p12, %p1572_p11 }
  0x67   : > { %p1568_p10 = pneg %p1567_p9 }
  0x69   : > { %p1575_p3 = pnand %p1574_p1, %p1568_p10 }
  0x6b   : > { %1578 = shalt.err (!%p1575_p3)
}
  0x6c   : > { %1372 = dma.hbm_to_vmem [thread:$0]  (!%p1822_p5), %s2142_s4, 16, %s333_s11, [#allocation5]  }
  0x6d   : > { %s1579_s21 = scalar_lea.hbm %s2144_s6, 16 }
  0x6e   : > { %p1580_p13 = scmp.ne.s32.totalorder %s2144_s6, %s1579_s21  ;;  %p1586_p3 = scmp.lt.u32.totalorder %s1579_s21, %s2144_s6 }
  0x70   : > { %p1582_p0 = pnand %p1580_p13, %p1838_p7 }
  0x72   : > { %p1583_p1 = pneg %p1582_p0 }
  0x74   : > { %p1588_p2 = pnand %p1586_p3, %p1583_p1 }
  0x76   : > { %1591 = shalt.err (!%p1588_p2)
}
  0x77   : > { %s1592_s29 = scalar_lea.vmem %s357_s14, 16  ;;  %s1599_s11 = scalar_lea.vmem %s357_s14, 32 }
  0x78   : > { %p1593_p4 = scmp.ne.s32.totalorder %s357_s14, %s1592_s29  ;;  %p1600_p9 = scmp.lt.s32.totalorder %s357_s14, %s357_s14 }
  0x79   : > { %p1601_p10 = scmp.lt.s32.totalorder %s1599_s11, %s1592_s29 }
  0x7a   : > { %p1595_p6 = pnand %p1593_p4, %p1838_p7 }
  0x7b   : > { %p1602_p11 = por %p1601_p10, %p1600_p9 }
  0x7c   : > { %p1596_p8 = pneg %p1595_p6 }
  0x7e   : > { %p1603_p12 = pnand %p1602_p11, %p1596_p8 }
  0x80   : > { %1606 = shalt.err (!%p1603_p12)
}
  0x81   : > { %1378 = dma.hbm_to_vmem [thread:$0]  (!%p1822_p5), %s2144_s6, 16, %s357_s14, [#allocation8]  }
  0x82   : > { %s1720_s13 = smov [#allocation12]   ;;  %s1607_s25 = scalar_lea.hbm %s2146_s8, 16 }
  0x83   : > { %s380_s1 = sshll.u32 %s1720_s13, 4  ;;  %p1608_p13 = scmp.ne.s32.totalorder %s2146_s8, %s1607_s25  ;;  %s381_s1 = int_to_ptr.vmem [resolvable:$true] %s380_s1 }
  0x84   : > { %p1614_p3 = scmp.lt.u32.totalorder %s1607_s25, %s2146_s8 }
  0x85   : > { %p1610_p0 = pnand %p1608_p13, %p1838_p7 }
  0x87   : > { %p1611_p1 = pneg %p1610_p0 }
  0x89   : > { %p1616_p2 = pnand %p1614_p3, %p1611_p1 }
  0x8b   : > { %1619 = shalt.err (!%p1616_p2)
}
  0x8c   : > { %s1620_s14 = scalar_lea.vmem %s381_s1, 16  ;;  %s1627_s11 = scalar_lea.vmem %s381_s1, 32 }
  0x8d   : > { %p1621_p4 = scmp.ne.s32.totalorder %s381_s1, %s1620_s14  ;;  %p1628_p9 = scmp.lt.s32.totalorder %s381_s1, %s381_s1 }
  0x8e   : > { %p1629_p10 = scmp.lt.s32.totalorder %s1627_s11, %s1620_s14 }
  0x8f   : > { %p1623_p6 = pnand %p1621_p4, %p1838_p7 }
  0x90   : > { %p1630_p11 = por %p1629_p10, %p1628_p9 }
  0x91   : > { %p1624_p8 = pneg %p1623_p6 }
  0x93   : > { %p1631_p12 = pnand %p1630_p11, %p1624_p8 }
  0x95   : > { %1634 = shalt.err (!%p1631_p12)
}
  0x96   : > { %1384 = dma.hbm_to_vmem [thread:$0]  (!%p1822_p5), %s2146_s8, 16, %s381_s1, [#allocation11]  }
  0x97   : > { %s1969_s16 = sadd.s32 1, %s1711_s20   ;;  %s35_s27 = sadd.s32 1, %s1707_s19 }
  0x98   : > { %s32_s13 = ssub.s32 %s1711_s20, %s1969_s16  ;;  %p42_p7 = scmp.ne.s32.totalorder %s1707_s19, %s1703_s18 }
  0x99   : > { %p33_p13 = scmp.eq.s32.totalorder %s32_s13, 0  ;;  %p43_p0 = scmp.eq.s32.totalorder %s1711_s20, 0 }
  0x9a   : > { %p48_p1 = scmp.ne.s32.totalorder %s1703_s18, %s1699_s17  ;;  %p1395_p3 = scmp.lt.s32.totalorder %s1711_s20, 2 }
  0x9b   : > { %s1981_s15 = scalar_select %p33_p13, %s1707_s19, %s35_s27  }
  0x9c   : > { %p44_p2 = por %p43_p0, %p42_p7  ;;  %p2161_p4 = scmp.eq.s32.totalorder %s1807_s23, 0 }
  0x9d   : > { %s394_s25 = sand.u32 1, %s1707_s19   ;;  %s1261_s1 = sshll.u32 %s1711_s20, 7 }
  0x9e   : > { %p1985_p6 = por %p2161_p4, %p48_p1  ;;  %s1219_s28 = sshll.u32 %s394_s25, 3 }
  0x9f   : > { %s1994_s29 = scalar_lea.hbm %s2138_s0, %s1261_s1  ;;  %s398_s17 = scalar_lea.vmem [#allocation2], %s1219_s28 }
  0xa0   : > { %s405_s14 = sshll.u32 %s398_s17, 4  ;;  %p1996_p5 = pnand %p1395_p3, %p44_p2  ;;  %s2000_s14 = int_to_ptr.vmem [resolvable:$true] %s405_s14 }
  0xa1   : > { %s2002_s20 = scalar_lea.sflag [#allocation3], %s394_s25  ;;  %s1635_s9 = scalar_lea.hbm %s1994_s29, 128 }
  0xa2   : > { %p1636_p8 = scmp.ne.s32.totalorder %s1994_s29, %s1635_s9  ;;  %p1637_p9 = pneg %p1996_p5 }
  0xa3   : > { %s1640_s13 = scalar_lea.hbm %s2138_s0, 256  ;;  %p1641_p12 = scmp.lt.u32.totalorder %s1994_s29, %s2138_s0 }
  0xa4   : > { %p1638_p10 = pnand %p1637_p9, %p1636_p8  ;;  %p1642_p7 = scmp.lt.u32.totalorder %s1640_s13, %s1635_s9 }
  0xa5   : > { %p1644_p0 = scmp.lt.u32.totalorder %s1635_s9, %s1994_s29 }
  0xa6   : > { %p1639_p11 = pneg %p1638_p10  ;;  %p1643_p13 = por %p1642_p7, %p1641_p12 }
  0xa8   : > { %p1645_p1 = por %p1644_p0, %p1643_p13 }
  0xaa   : > { %p1646_p3 = pnand %p1645_p1, %p1639_p11 }
  0xac   : > { %1649 = shalt.err (!%p1646_p3)
}
  0xad   : > { %s1650_s25 = scalar_lea.vmem %s2000_s14, 128  ;;  %s1721_s26 = smov [#allocation2]  }
  0xae   : > { %p1651_p2 = scmp.ne.s32.totalorder %s2000_s14, %s1650_s25  ;;  %s1655_s22 = sshll.u32 %s1721_s26, 4  ;;  %s1656_s22 = int_to_ptr.vmem [resolvable:$false] %s1655_s22 }
  0xaf   : > { %s1657_s17 = scalar_lea.vmem %s1656_s22, 256  ;;  %p1658_p10 = scmp.lt.s32.totalorder %s2000_s14, %s1656_s22 }
  0xb0   : > { %p1653_p4 = pnand %p1651_p2, %p1637_p9  ;;  %p1659_p12 = scmp.lt.s32.totalorder %s1657_s17, %s1650_s25 }
  0xb2   : > { %p1654_p8 = pneg %p1653_p4  ;;  %p1660_p7 = por %p1659_p12, %p1658_p10 }
  0xb4   : > { %p1661_p13 = pnand %p1660_p7, %p1654_p8 }
  0xb6   : > { %1664 = shalt.err (!%p1661_p13)
}
  0xb7   : > { %1388 = dma.hbm_to_vmem [thread:$0]  (!%p1996_p5), %s1994_s29, 128, %s2000_s14, %s2002_s20, %s1716_s30, %s1716_s30, %s1717_s12  }
  0xb8   : > { %p2164_p9 = scmp.ne.s32.totalorder %s2157_s24, 0 }
  0xb9   : > { %s419_s9 = sand.u32 (!%p2164_p9), 1, %s1703_s18  }
  0xba   : > { %417 = sbr.rel (%p2164_p9) target bundleno = 1870 (0x74e), region = 60  ;;  %s1223_s10 = sshll.u32 (!%p2164_p9), %s419_s9, 3 }
  0xbb   : > { %s420_s27 = scalar_lea.sflag (!%p2164_p9), [#allocation3], %s419_s9  ;;  %s423_s13 = scalar_lea.vmem (!%p2164_p9), [#allocation2], %s1223_s10 }
  0xc1   : > { %1682 = dma.done.wait (%p1985_p6), %s420_s27, 128  }
  0xc2   : > { %1684 = vsyncadd (%p1985_p6), %s420_s27, 4294967168  ;;  %p2165_p11 = scmp.eq.s32.totalorder %s1807_s23, 0 }
  0xc4   : > { %1686 = dma.done.wait (%p2165_p11), [#allocation5], 784   ;;  %p2166_p0 = pmov %p2165_p11 }
  0xc6   : > { %1688 = vsyncadd (%p2166_p0), [#allocation5], 4294966512  ;;  %p2167_p5 = pmov %p2166_p0 }
  0xc7   : > { %p2168_p1 = pmov %p2166_p0 }
  0xc8   : > { %1690 = dma.done.wait (%p2167_p5), [#allocation8], 272  }
  0xc9   : > { %1692 = vsyncadd (%p2168_p1), [#allocation8], 4294967024  ;;  %p2169_p3 = pmov %p2166_p0 }
  0xca   : > { %p2170_p2 = pmov %p2166_p0 }
  0xcb   : > { %1694 = dma.done.wait (%p2169_p3), [#allocation11], 272  }
  0xcc   : > { %1696 = vsyncadd (%p2170_p2), [#allocation11], 4294967024  ;;  %v1722_v0 = vmov 0.0   ;;  %vm1723_vm0 = vmmov 0   ;;  %v1447_v1 = vld [vmem:[#allocation4 + $0x10] sm:$0xff]   ;;  %v1448_v2 = vld [vmem:[#allocation4] sm:$0xff]  }
  0xcd   : > { %1285 = vmatprep.subr.bf16.mxu0 %v1722_v0  ;;  %1293 = vmatprep.subr.bf16.mxu1 %v1722_v0  ;;  %v1449_v3 = vld [vmem:[#allocation4 + $0x18] sm:$0xff]   ;;  %v1450_v4 = vld [vmem:[#allocation4 + $0x8] sm:$0xff]   ;;  %vm559_vm1 = vcmask 261120   ;;  %v1453_v11 = vld [vmem:[#allocation4 + $0x20] sm:$0xff]   ;;  %vm729_vm2 = vcmask 259072   ;;  %s1724_s29 = smov 64  }
  0xce   : > { %1289 = vmatprep.mubr.msk.bf16.mxu0 %vm1723_vm0, %v1722_v0  ;;  %1297 = vmatprep.mubr.msk.bf16.mxu1 %vm1723_vm0, %v1722_v0  ;;  %v2060_v5 = vld [vmem:[%s423_s13] sm:$0xf]  ;;  %v2062_v6 = vld [vmem:[%s423_s13 + $0x4] sm:$0xf]  ;;  %v1454_v13 = vld [vmem:[#allocation4 + $0x28] sm:$0xff]   ;;  %s1725_s14 = smov 96  }
  0xcf   : > { %1286 = vmatpush3.bf16.msra.mxu0 %v1447_v1  ;;  %1294 = vmatpush3.bf16.msra.mxu1 %v1448_v2  ;;  %v1234_v7 = vcombine.low %v2060_v5, %v2062_v6  ;;  %v1244_v26 = vld [vmem:[%s2140_s2] ss:$0 sm:$0xff]  ;;  %v1455_v46 = vld [vmem:[#allocation7] sm:$0xff]   ;;  %v1456_v47 = vld [vmem:[#allocation7 + $0x8] sm:$0xff]   ;;  %vm863_vm3 = vcmask 1046528   ;;  %vm856_vm4 = vcmask 113664  }
  0xd0   : > { %1287 = vmatprep.subr.bf16.mxu0 %v1722_v0  ;;  %1295 = vmatprep.subr.bf16.mxu1 %v1722_v0  ;;  %v1245_v56 = vld [vmem:[%s2141_s3] ss:$0 sm:$0xff]  ;;  %v1247_v2 = vld [vmem:[#allocation9] ss:$0 sm:$0xff]  ;;  %s2171_s1 = sld [smem:[#allocation18_spill]]  ;;  %p491_p6 = scmp.lt.s32.totalorder %s1807_s23, 1 }
  0xd1   : > { %v541_v8 = vshrl.u32 %v1234_v7, 16  ;;  %v543_v9 = vshll.u32 %v1234_v7, 16  ;;  %v659_v14 = vrot.slane %v1234_v7, 1  ;;  %v1246_v60 = vld [vmem:[#allocation6] ss:$0 sm:$0xff]  ;;  %vm1043_vm5 = vcmask 1043456  }
  0xd2   : > { %vm1044_vm6 = vsmask.f32 3328  ;;  %s2179_s23 = smov (!%p491_p6, %s1807_s23), 1  ;;  %s2172_s24 = sld [smem:[#allocation20_spill]] }
  0xd3   : > { %1288 = vmatpush3.bf16.msra.mxu0 %v1449_v3  ;;  %1296 = vmatpush3.bf16.msra.mxu1 %v1450_v4  ;;  %v545_v10 = vrot.slane %v543_v9, 1  ;;  %vm1045_vm7 = vmand %vm1043_vm5, %vm1044_vm6  ;;  %s1262_s10 = sshll.u32 %s2179_s23, 4 }
  0xd4   : > { %1301 = vmatprep.subr.bf16.mxu0 %v1722_v0  ;;  %1309 = vmatprep.subr.bf16.mxu1 %v1722_v0 }
  0xd5   : > { %v546_v12 = vor.u32 %v545_v10, %v541_v8 }
  0xd6   : > { %1298 = vmatmul.mubr.msk.bf16.vlgmr.msra.gmra.mrb[0].mxu1 %vm559_vm1, %v1234_v7 }
  0xd7   : > { %1313 = vmatprep.mubr.msk.bf16.mxu1 %vm1723_vm0, %v1722_v0  ;;  %1290 = vmatmul.mubr.msk.bf16.vlgmr.msra.gmra.mrb[0].mxu0 %vm559_vm1, %v546_v12 }
  0xd8   : > { %1302 = vmatpush3.bf16.msra.mxu0 %v1453_v11  ;;  %1305 = vmatprep.mubr.msk.bf16.mxu0 %vm1723_vm0, %v1722_v0  ;;  %s500_s30 = scalar_lea.vmem %s2172_s24, %s1262_s10 }
  0xd9   : > { %1303 = vmatprep.subr.bf16.mxu0 %v1722_v0  ;;  %1310 = vmatpush3.bf16.msra.mxu1 %v1455_v46 }
  0xda   : > { %1311 = vmatprep.subr.bf16.mxu1 %v1722_v0 }
  0xdc   : > { %1304 = vmatpush3.bf16.msra.mxu0 %v1454_v13 }
  0xdd   : > { %1312 = vmatpush3.bf16.msra.mxu1 %v1456_v47 }
  0xde   : > { %1323 = vmatprep.subr.bf16.mxu1 %v1722_v0 }
  0xdf   : > { %1306 = vmatmul.mubr.msk.bf16.vlgmr.msra.gmra.mrb[4].mxu0 %vm559_vm1, %v659_v14 }
 0x1a9   : > { %v652_v15 = vpop.f32.mrb[0].mxu1 }
 0x1aa   : > { %v1299_v16 = vpop.f32.mrb[1].mxu1  ;;  %v597_v18 = vpop.f32.mrb[0].mxu0 }
 0x1ab   : > { %v655_v17 = vpop.f32.mrb[2].mxu1  ;;  %v653_v20 = vadd.f32 %v652_v15, %v597_v18  ;;  %v1291_v21 = vpop.f32.mrb[1].mxu0  ;;  %v531_v18 = vld [vmem:[%s2171_s1 + $0x10] sm:$0xff] }
 0x1ac   : > { %v1300_v19 = vpop.f32.mrb[3].mxu1  ;;  %v600_v22 = vpop.f32.mrb[2].mxu0  ;;  %v529_v21 = vld [vmem:[%s2171_s1] sm:$0xff] }
 0x1ad   : > { %v656_v23 = vadd.f32 %v655_v17, %v600_v22  ;;  %v1292_v24 = vpop.f32.mrb[3].mxu0  ;;  %v1457_v17 = vld [vmem:[#allocation10] sm:$0xff]  }
 0x1b2   : > { %v709_v25 = vpop.f32.mrb[4].mxu0 }
 0x1b3   : > { %v716_v27 = vadd.f32 %v709_v25, %v653_v20  ;;  %v1307_v28 = vpop.f32.mrb[5].mxu0  ;;  %v532_v20 = vld [vmem:[%s2171_s1 + $0x18] sm:$0xff] }
 0x1b4   : > { %v712_v29 = vpop.f32.mrb[6].mxu0 }
 0x1b5   : > { %v717_v30 = vadd.f32 %v712_v29, %v656_v23  ;;  %v1308_v31 = vpop.f32.mrb[7].mxu0  ;;  %v724_v32 = vadd.f32 %v1244_v26, %v716_v27  ;;  %v530_v23 = vld [vmem:[%s2171_s1 + $0x8] sm:$0xff] }
 0x1b7   : > { %v726_v33 = vsel %vm559_vm1, %v724_v32, 0.0  ;;  %v725_v34 = vadd.f32 %v1244_v26, %v717_v30 }
 0x1b8   : > { %727 = vadd.xlane.f32.xlu0 %v726_v33 }
 0x1b9   : > { %v730_v35 = vsel %vm729_vm2, %v725_v34, 0.0 }
 0x1bc   : > { %731 = vadd.xlane.f32.xlu0 %v730_v35 }
 0x245   : > { %v728_v36 = vpop.xlane.xlu0 %727 }
 0x246   : > { %v734_v37 = vmul.f32 0.03125, %v728_v36 }
 0x248   : > { %v736_v38 = vsub.f32 %v724_v32, %v734_v37  ;;  %v1458_v32 = vld [vmem:[#allocation10 + $0x8] sm:$0xff]  }
 0x249   : > { %v732_v39 = vpop.xlane.xlu0 %731 }
 0x24a   : > { %v735_v40 = vmul.f32 0.03125, %v732_v39  ;;  %v738_v41 = vmul.f32 %v736_v38, %v736_v38 }
 0x24c   : > { %v737_v42 = vsub.f32 %v725_v34, %v735_v40  ;;  %v740_v43 = vsel %vm559_vm1, %v738_v41, 0.0 }
 0x24d   : > { %741 = vadd.xlane.f32.xlu1 %v740_v43 }
 0x24e   : > { %v739_v44 = vmul.f32 %v737_v42, %v737_v42 }
 0x250   : > { %v743_v45 = vsel %vm729_vm2, %v739_v44, 0.0 }
 0x251   : > { %744 = vadd.xlane.f32.xlu1 %v743_v45 }
 0x2da   : > { %v742_v48 = vpop.xlane.xlu1 %741 }
 0x2db   : > { %v746_v49 = vmul.f32 0.03125, %v742_v48 }
 0x2dd   : > { %v748_v50 = vadd.f32 1e-06, %v746_v49 }
 0x2de   : > { %v745_v51 = vpop.xlane.xlu1 %744 }
 0x2df   : > { %1459 = vrsqrt.f32 %v748_v50  ;;  %v747_v52 = vmul.f32 0.03125, %v745_v51 }
 0x2e1   : > { %v749_v53 = vadd.f32 1e-06, %v747_v52 }
 0x2e3   : > { %1461 = vrsqrt.f32 %v749_v53 }
 0x2e9   : > { %v1460_v54 = vpop.eup %1459 }
 0x2ea   : > { %v752_v55 = vmul.f32 %v1460_v54, %v736_v38  ;;  %v1258_v38 = vcombine.low %v2062_v6, %v2062_v6 }
 0x2ec   : > { %v760_v58 = vmul.f32 %v1245_v56, %v752_v55  ;;  %v1035_v39 = vshrl.u32 %v1258_v38, 16  ;;  %v1038_v40 = vshll.u32 %v1258_v38, 16 }
 0x2ed   : > { %v1462_v57 = vpop.eup %1461 }
 0x2ee   : > { %v753_v59 = vmul.f32 %v1462_v57, %v737_v42  ;;  %v768_v62 = vadd.f32 %v1246_v60, %v760_v58  ;;  %v1037_v41 = vrot.slane %v1035_v39, 4  ;;  %v1040_v42 = vrot.slane %v1038_v40, 5 }
 0x2f0   : > { %v761_v61 = vmul.f32 %v1245_v56, %v753_v59  ;;  %v1041_v47 = vor.u32 %v1040_v42, %v1037_v41 }
 0x2f2   : > { %v769_v63 = vadd.f32 %v1246_v60, %v761_v61  ;;  %v1046_v6 = vsel %vm1045_vm7, %v2060_v5, %v1041_v47 }
 0x2f3   : > { %v1047_v50 = vunpack.c.l.bf16 %v1046_v6  ;;  %v1048_v51 = vunpack.c.h.bf16 %v1046_v6 }
 0x2f4   : > { %v770_v1 = vpack.c.bf16 %v769_v63, %v768_v62 }
 0x2f6   : > { %1314 = vmatmul.mubr.msk.bf16.vlgmr.msra.gmra.mrb[4].mxu1 %vm559_vm1, %v770_v1 }
 0x2f7   : > { %1327 = vmatprep.mubr.msk.bf16.mxu1 %vm1723_vm0, %v1722_v0 }
 0x3c9   : > { %v826_v3 = vpop.f32.mrb[4].mxu1 }
 0x3ca   : > { %v1315_v4 = vpop.f32.mrb[5].mxu1  ;;  %v827_v8 = vadd.f32 %v1247_v2, %v826_v3 }
 0x3cb   : > { %v829_v7 = vpop.f32.mrb[6].mxu1 }
 0x3cc   : > { %v830_v9 = vadd.f32 %v1247_v2, %v829_v7  ;;  %v1316_v10 = vpop.f32.mrb[7].mxu1 }
 0x3ce   : > { %v833_v11 = vpack.c.bf16 %v830_v9, %v827_v8 }
 0x3d0   : > { %854 = vrot.lane.b32.xlu1 %v833_v11, %s1724_s29  ;;  %835 = vrot.lane.b32.xlu0 %v833_v11, %s1725_s14  ;;  %s2173_s29 = sld [smem:[#allocation19_spill]] }
 0x3d6   : > { %s495_s14 = scalar_lea.vmem %s2173_s29, %s1262_s10 }
 0x442   : > { %v855_v12 = vpop.permute.xlu1 %854  ;;  %v836_v13 = vpop.permute.xlu0 %835 }
 0x443   : > { %v865_v14 = vsel %vm863_vm3, %v855_v12, 0  ;;  %1339 = vmatprep.subr.msk.bf16.mxu0 %vm863_vm3, %v855_v12  ;;  %838 = vxpose.xlu1.c.b16.start.end [1/1] (short) (narrow) %v836_v13, 32 }
 0x444   : > { %1318 = vmatpush3.bf16.msra.mxu0 %v865_v14 }
 0x445   : > { %1331 = vmatprep.subr.bf16.mxu0 %v1722_v0 }
 0x4a9   : > { %v846_v15 = vpop.trf.xlu1 }
 0x4aa   : > { %1319 = vmatprep.mubr.msk.bf16.mxu0 %vm856_vm4, %v846_v15 }
 0x4ad   : > { %v847_v16 = vpop.trf.xlu1 }
 0x4ae   : > { %1320 = vmatmul.mubr.msk.bf16.vlgmr.msra.gmra.mrb[8].mxu0 %vm856_vm4, %v847_v16 }
 0x4af   : > { %1335 = vmatprep.mubr.msk.bf16.mxu0 %vm1723_vm0, %v1722_v0  ;;  %1332 = vmatpush3.bf16.msra.mxu0 %v1457_v17 }
 0x4b0   : > { %1333 = vmatprep.subr.bf16.mxu0 %v1722_v0 }
 0x4b3   : > { %1334 = vmatpush3.bf16.msra.mxu0 %v1458_v32 }
 0x581   : > { %v1321_v19 = vpop.f32.mrb[8].mxu0 }
 0x582   : > { %v901_v22 = vpop.f32.mrb[9].mxu0  ;;  %v918_v25 = vmul.f32 %v1321_v19, %v531_v18 }
 0x583   : > { %v1322_v24 = vpop.f32.mrb[10].mxu0  ;;  %v916_v28 = vmul.f32 %v901_v22, %v529_v21 }
 0x584   : > { %v919_v26 = vmul.f32 %v1322_v24, %v532_v20  ;;  %v904_v27 = vpop.f32.mrb[11].mxu0 }
 0x585   : > { %v917_v29 = vmul.f32 %v904_v27, %v530_v23 }
 0x586   : > { %v921_v30 = vpack.c.bf16 %v919_v26, %v918_v25 }
 0x587   : > { %v920_v31 = vpack.c.bf16 %v917_v29, %v916_v28 }
 0x589   : > { %1324 = vmatpush3.bf16.msra.mxu1 %v920_v31 }
 0x58a   : > { %1325 = vmatprep.subr.bf16.mxu1 %v1722_v0  ;;  %v1254_v0 = vld [vmem:[#allocation12] ss:$0 sm:$0xff] }
 0x58d   : > { %1326 = vmatpush3.bf16.msra.mxu1 %v921_v30 }
 0x590   : > { %1328 = vmatmul.mubr.msk.bf16.vlgmr.msra.gmra.mrb[8].mxu1 %vm559_vm1, %v833_v11 }
 0x663   : > { %v959_v33 = vpop.f32.mrb[8].mxu1 }
 0x664   : > { %v1329_v34 = vpop.f32.mrb[9].mxu1 }
 0x665   : > { %v962_v35 = vpop.f32.mrb[10].mxu1 }
 0x666   : > { %v966_v36 = vpack.c.bf16 %v962_v35, %v959_v33  ;;  %v1330_v37 = vpop.f32.mrb[11].mxu1 }
 0x668   : > { %1336 = vmatmul.mubr.msk.bf16.vlgmr.msra.gmra.mrb[12].mxu0 %vm559_vm1, %v966_v36 }
 0x73b   : > { %v1022_v43 = vpop.f32.mrb[12].mxu0 }
 0x73c   : > { %v1023_v44 = vadd.f32 %v1254_v0, %v1022_v43  ;;  %v1337_v45 = vpop.f32.mrb[13].mxu0 }
 0x73d   : > { %v1025_v46 = vpop.f32.mrb[14].mxu0 }
 0x73e   : > { %1463 = vtanh.f32 %v1023_v44  ;;  %v1026_v48 = vadd.f32 %v1254_v0, %v1025_v46  ;;  %v1338_v49 = vpop.f32.mrb[15].mxu0 }
 0x740   : > { %1465 = vtanh.f32 %v1026_v48 }
 0x748   : > { %v1464_v52 = vpop.eup %1463 }
 0x749   : > { %1031 = vst.msk [vmem:[%s500_s30] sm:$0xff] %vm559_vm1, %v1464_v52  ;;  %v1049_v53 = vadd.f32 %v1464_v52, %v1047_v50 }
 0x74a   : > { %v1466_v54 = vpop.eup %1465 }
 0x74b   : > { %1051 = vst.msk [vmem:[%s495_s14] sm:$0xff] %vm559_vm1, %v1049_v53  ;;  %v1050_v5 = vadd.f32 %v1466_v54, %v1048_v51 }
 0x74c   : > { %1032 = vst.msk [vmem:[%s500_s30 + $0x8] sm:$0x3f] %vm729_vm2, %v1466_v54 }
 0x74d   : > { %1052 = vst.msk [vmem:[%s495_s14 + $0x8] sm:$0x3f] %vm729_vm2, %v1050_v5 }
 0x74e PF: > { %p25_p4 = scmp.ge.s32.totalorder %s1969_s16, 4   ;;  %s2174_s17 = smov %s1703_s18 }
 0x74f   : > { %s2175_s18 = smov %s1707_s19  ;;  %s2176_s19 = smov %s1981_s15 }
 0x750   : > { %s2177_s20 = smov %s1969_s16  ;;  %27 = sbr.rel (!%p25_p4) target bundleno = 11 (0xb), region = 138 }
 0x757   :  { %1090 = vsyncpa [#allocation3], 1 }
 0x758   :  { %1092 = vsyncpa [#allocation3 + $0x1], 1 }
 0x759   :  { %1093 = vsyncpa [#allocation5], 1 }
 0x75a   :  { %1094 = vsyncpa [#allocation8], 1 }
 0x75b   :  { %1095 = vsyncpa [#allocation11], 1 }

</bundles_post_ra>
